<compile_context>
chip_gen: v7x
topology: tpu7x:2x2x1
jax: 0.10.0
libtpu: 0.0.40
codegen_flags: <defaults>
</compile_context>

<pallas_src>
import functools

import jax
import jax.numpy as jnp
import numpy as np
from jax import lax
from jax.experimental import pallas as pl
from jax.experimental.pallas import tpu as pltpu


def _extracted_fact_loss_kernel(
    lp_ref, tgt_ref, out_ref,
    lm_sum_ref, lm_cnt_ref, clf_acc_ref, nofact_lp_ref, clf_ref,
    *, nofact_token_id, ignore_index, lm_weight, nofact_weight,
    clf_loss, seq_start, seq_len, vocab_size,
):
    t_idx = pl.program_id(1)
    v_idx = pl.program_id(2)
    n_t = pl.num_programs(1)
    n_v = pl.num_programs(2)

    t_blk, v_blk = lp_ref.shape          # (T_TILE, V_TILE); batch dim squeezed
    t_seq = seq_start // t_blk           # static: t-tile containing seq_start
    local_s = seq_start - t_seq * t_blk  # static: row of seq_start inside it

    # ---- init accumulators at the start of each batch row's (t, v) sweep ----
    @pl.when(jnp.logical_and(t_idx == 0, v_idx == 0))
    def _():
        lm_sum_ref[...] = jnp.zeros_like(lm_sum_ref)
        lm_cnt_ref[...] = jnp.zeros_like(lm_cnt_ref)
        nofact_lp_ref[...] = jnp.zeros_like(nofact_lp_ref)
        clf_ref[...] = jnp.zeros_like(clf_ref)
        if clf_loss is None:
            clf_acc_ref[...] = jnp.zeros_like(clf_acc_ref)       # sum accumulator
        else:
            clf_acc_ref[...] = jnp.full_like(clf_acc_ref, -jnp.inf)  # running max

    lp = lp_ref[...].astype(jnp.float32)     # [t_blk, v_blk] (bf16 -> f32 per tile)
    tgt = tgt_ref[...]                       # [t_blk, 1] int32

    v_off = v_idx * v_blk
    t_off = t_idx * t_blk

    # One-hot gather of lp[t, tgt[t]] restricted to this vocab tile:
    # compare a tile-local lane iota against (tgt - v_off) -- no global iota.
    lane_ids = lax.broadcasted_iota(jnp.int32, (t_blk, v_blk), 1)
    onehot = lane_ids == (tgt - v_off)                                   # [t_blk, v_blk]
    gathered = jnp.sum(jnp.where(onehot, lp, 0.0), axis=1, keepdims=True)  # [t_blk, 1]

    t_ids = t_off + lax.broadcasted_iota(jnp.int32, (t_blk, 1), 0)       # [t_blk, 1]
    in_range = t_ids < seq_len                                           # masks ragged T edge
    valid = jnp.logical_and(tgt != ignore_index, in_range)

    # NLLLoss(reduction='none'): -w[y] * logprob[y]; 0 at ignore_index.
    if nofact_weight is None or float(nofact_weight) == 1.0:
        wneg = -gathered
    else:
        w_tgt = jnp.where(tgt == nofact_token_id, float(nofact_weight), 1.0)
        wneg = -w_tgt * gathered
    nll_part = jnp.where(valid, wneg, 0.0)                               # [t_blk, 1]

    # ---- LM loss accumulation (positions t >= seq_start) ----
    lm_pos = t_ids >= seq_start
    lm_sum_ref[...] += jnp.sum(jnp.where(lm_pos, nll_part, 0.0), axis=0, keepdims=True)

    @pl.when(v_idx == 0)   # count each time position only once (not per v-tile)
    def _():
        lm_cnt_ref[...] += jnp.sum(
            jnp.where(jnp.logical_and(lm_pos, valid), 1.0, 0.0),
            axis=0, keepdims=True)

    # ---- classification ("fact") loss accumulation at t == seq_start ----
    @pl.when(t_idx == t_seq)
    def _():
        if clf_loss is None:
            # clf = NLL at seq_start; only the v-tile containing tgt[seq_start]
            # contributes a nonzero value, so summing across v-tiles is exact.
            clf_acc_ref[...] += nll_part[local_s:local_s + 1, :]
        else:
            lp_row = lp[local_s:local_s + 1, :]                          # [1, v_blk]
            row_ids = lax.broadcasted_iota(jnp.int32, (1, v_blk), 1)
            is_nofact_lane = row_ids == (nofact_token_id - v_off)
            in_vocab = row_ids < (vocab_size - v_off)                    # ragged V edge
            fact_mask = jnp.logical_and(in_vocab, jnp.logical_not(is_nofact_lane))
            tile_max = jnp.max(jnp.where(fact_mask, lp_row, -jnp.inf),
                               axis=1, keepdims=True)                    # [1, 1]
            clf_acc_ref[...] = jnp.maximum(clf_acc_ref[...], tile_max)
            nofact_lp_ref[...] += jnp.sum(jnp.where(is_nofact_lane, lp_row, 0.0),
                                          axis=1, keepdims=True)

    @pl.when(jnp.logical_and(t_idx == t_seq, v_idx == n_v - 1))
    def _():
        if clf_loss is None:
            clf_ref[...] = clf_acc_ref[...]
        else:
            is_nofact = tgt[local_s:local_s + 1, :] == nofact_token_id   # [1, 1] bool
            lp_nofact = nofact_lp_ref[...]
            max_fact = clf_acc_ref[...]
            if clf_loss == "reweighted":
                clf_ref[...] = jnp.where(is_nofact, -lp_nofact, -max_fact)
            else:  # "inverse"  (exact division: per-row scalar, negligible cost)
                clf_ref[...] = jnp.where(is_nofact, -1.0 / max_fact, -1.0 / lp_nofact)

    # ---- finalize per-batch-row losses ----
    @pl.when(jnp.logical_and(t_idx == n_t - 1, v_idx == n_v - 1))
    def _():
        # NOTE: if every t >= seq_start position is ignore_index this is 0/0
        # -> NaN, matching torch.nn.NLLLoss(reduction='mean') behavior.
        lm_loss = lm_sum_ref[...] / lm_cnt_ref[...]                      # [1, 1]
        clf = clf_ref[...]
        comb = (1.0 - lm_weight) * clf + lm_weight * lm_loss
        lane3 = lax.broadcasted_iota(jnp.int32, (1, 3), 1)
        out_ref[...] = jnp.where(lane3 == 0, comb,
                                 jnp.where(lane3 == 1, clf, lm_loss))


def extracted_fact_loss(
    lm_logprobs, target, *,
    nofact_token_id, ignore_index=-100, lm_weight=0.5,
    nofact_weight=None, num_tokens=None, clf_loss=None, seq_start=1,
    v_tile=2048, t_tile=512,
):
    """JAX/Pallas equivalent of ExtractedFactLoss.forward.

    lm_logprobs: [B, T, V] log-probabilities (f32 or bf16 -- pass bf16 straight
                 from the model; the kernel casts per tile).
    target:      [B, T] int labels (ignore_index allowed).
    Returns (combined_loss, classification_loss, lm_loss) scalars (batch mean).
    """
    B, T, V = lm_logprobs.shape
    assert target.shape == (B, T)
    assert T > seq_start
    assert 0 <= nofact_token_id < V
    assert clf_loss in (None, "reweighted", "inverse")
    if nofact_weight is not None and num_tokens is not None:
        assert num_tokens > nofact_token_id

    # Tile sizes: full dim if it fits, else aligned (8 for T, 128 for V);
    # ragged last tiles are masked in-kernel.  Defaults sized for v7x's
    # 32 MiB scoped VMEM; on v5e/v6e larger v_tile (4096-8192) is fine.
    t_blk = T if T <= t_tile else max(8, (int(t_tile) // 8) * 8)
    v_blk = V if V <= v_tile else max(128, (int(v_tile) // 128) * 128)
    n_t = pl.cdiv(T, t_blk)
    n_v = pl.cdiv(V, v_blk)
    grid = (B, n_t, n_v)

    kernel = functools.partial(
        _extracted_fact_loss_kernel,
        nofact_token_id=int(nofact_token_id),
        ignore_index=int(ignore_index),
        lm_weight=float(lm_weight),
        nofact_weight=None if nofact_weight is None else float(nofact_weight),
        clf_loss=clf_loss,
        seq_start=int(seq_start),
        seq_len=int(T),
        vocab_size=int(V),
    )

    lp_spec = pl.BlockSpec((None, t_blk, v_blk), lambda b, t, v: (b, t, v))
    tgt_spec = pl.BlockSpec((None, t_blk, 1), lambda b, t, v: (b, t, 0))
    out_spec = pl.BlockSpec((None, 1, 3), lambda b, t, v: (b, 0, 0))

    bytes_accessed = (int(np.prod(lm_logprobs.shape)) * lm_logprobs.dtype.itemsize
                      + B * T * 4 + B * 3 * 4)
    cost = pl.CostEstimate(flops=5 * B * T * V, transcendentals=0,
                           bytes_accessed=bytes_accessed)

    target3 = target.astype(jnp.int32).reshape(B, T, 1)

    out = pl.pallas_call(
        kernel,
        out_shape=jax.ShapeDtypeStruct((B, 1, 3), jnp.float32),
        grid_spec=pltpu.PrefetchScalarGridSpec(
            num_scalar_prefetch=0,
            grid=grid,
            in_specs=[lp_spec, tgt_spec],
            out_specs=out_spec,
            scratch_shapes=[
                pltpu.VMEM((1, 1), jnp.float32),   # lm_sum
                pltpu.VMEM((1, 1), jnp.float32),   # lm_cnt
                pltpu.VMEM((1, 1), jnp.float32),   # clf sum / running max(fact)
                pltpu.VMEM((1, 1), jnp.float32),   # logprob at nofact token
                pltpu.VMEM((1, 1), jnp.float32),   # finalized clf per row
            ]),
        compiler_params=pltpu.CompilerParams(
            dimension_semantics=("parallel", "arbitrary", "arbitrary")),
        cost_estimate=cost,
    )(lm_logprobs, target3)

    comb, clf, lm = out[:, 0, 0], out[:, 0, 1], out[:, 0, 2]
    return jnp.mean(comb), jnp.mean(clf), jnp.mean(lm)


# ----------------------------- pure-JAX reference -----------------------------
def _reference(lm_logprobs, target, *, nofact_token_id, ignore_index, lm_weight,
               nofact_weight=None, clf_loss=None, seq_start=1):
    B, T, V = lm_logprobs.shape
    weight = np.ones((V,), dtype=np.float32)
    if nofact_weight is not None:
        weight[nofact_token_id] = nofact_weight
    weight = jnp.asarray(weight)
    safe_tgt = jnp.clip(target, 0, V - 1)
    gathered = jnp.take_along_axis(lm_logprobs.astype(jnp.float32),
                                   safe_tgt[:, :, None], axis=2)[:, :, 0]
    valid = target != ignore_index
    nll = jnp.where(valid, -weight[safe_tgt] * gathered, 0.0)
    lm = nll[:, seq_start:].sum(1) / valid[:, seq_start:].sum(1)
    if clf_loss is None:
        clf = nll[:, seq_start]
    else:
        lp_start = lm_logprobs[:, seq_start, :].astype(jnp.float32)
        lp_nofact = lp_start[:, nofact_token_id]
        masked = lp_start.at[:, nofact_token_id].set(-jnp.inf)
        max_fact = masked.max(axis=1)
        is_nf = target[:, seq_start] == nofact_token_id
        if clf_loss == "reweighted":
            clf = jnp.where(is_nf, -lp_nofact, -max_fact)
        else:
            clf = jnp.where(is_nf, -1.0 / max_fact, -1.0 / lp_nofact)
    comb = (1.0 - lm_weight) * clf + lm_weight * lm
    return comb.mean(), clf.mean(), lm.mean()


if __name__ == "__main__":
    # Small shapes; ragged in both T (12 vs tile 8) and V (320 vs tile 128)
    # to exercise the edge masking and the full (b, t, v) grid.
    B, T, V = 2, 12, 320
    seq_start = 1
    nofact_token_id = 3
    ignore_index = -100
    lm_weight = 0.5

    key = jax.random.PRNGKey(0)
    k1, k2 = jax.random.split(key)
    logits = jax.random.normal(k1, (B, T, V), dtype=jnp.float32)
    lm_logprobs = jax.nn.log_softmax(logits, axis=-1)           # [B, T, V]
    target = jax.random.randint(k2, (B, T), 0, V).astype(jnp.int32)
    target = target.at[0, 5].set(ignore_index)                  # exercise ignore_index
    target = target.at[1, seq_start].set(nofact_token_id)       # nofact at clf position

    configs = [
        dict(clf_loss=None, nofact_weight=None),
        dict(clf_loss="reweighted", nofact_weight=2.5, num_tokens=V),
        dict(clf_loss="inverse", nofact_weight=None),
    ]
    for cfg in configs:
        ref_cfg = {k: v for k, v in cfg.items() if k != "num_tokens"}
        got = extracted_fact_loss(
            lm_logprobs, target,
            nofact_token_id=nofact_token_id, ignore_index=ignore_index,
            lm_weight=lm_weight, seq_start=seq_start,
            v_tile=128, t_tile=8,            # small tiles -> multi-tile grid
            **cfg)
        got = jax.block_until_ready(got)
        want = _reference(
            lm_logprobs, target,
            nofact_token_id=nofact_token_id, ignore_index=ignore_index,
            lm_weight=lm_weight, seq_start=seq_start, **ref_cfg)
        for g, w in zip(got, want):
            np.testing.assert_allclose(np.asarray(g), np.asarray(w),
                                       rtol=1e-5, atol=1e-5)

    # Also run with production-default tiles (single tile covers toy shapes).
    got = extracted_fact_loss(
        lm_logprobs, target,
        nofact_token_id=nofact_token_id, ignore_index=ignore_index,
        lm_weight=lm_weight, seq_start=seq_start)
    got = jax.block_until_ready(got)
    want = _reference(
        lm_logprobs, target,
        nofact_token_id=nofact_token_id, ignore_index=ignore_index,
        lm_weight=lm_weight, seq_start=seq_start)
    for g, w in zip(got, want):
        np.testing.assert_allclose(np.asarray(g), np.asarray(w),
                                   rtol=1e-5, atol=1e-5)

    print("KERNEL_OK")
</pallas_src>

<mosaic_0001>
module attributes {stable_mosaic.version = 11 : i64} {
  func.func @_extracted_fact_loss_kernel(%arg0: i32, %arg1: i32, %arg2: i32, %arg3: memref<1x8x128xf32, #tpu.memory_space<vmem>>, %arg4: memref<1x8x1xi32, #tpu.memory_space<vmem>>, %arg5: memref<1x1x3xf32, #tpu.memory_space<vmem>>, %arg6: memref<1x1xf32, #tpu.memory_space<vmem>>, %arg7: memref<1x1xf32, #tpu.memory_space<vmem>>, %arg8: memref<1x1xf32, #tpu.memory_space<vmem>>, %arg9: memref<1x1xf32, #tpu.memory_space<vmem>>, %arg10: memref<1x1xf32, #tpu.memory_space<vmem>>) attributes {dimension_semantics = [#tpu.dimension_semantics<parallel>, #tpu.dimension_semantics<arbitrary>, #tpu.dimension_semantics<arbitrary>], iteration_bounds = array<i64: 2, 2, 3>, scalar_prefetch = 0 : i64, scratch_operands = 5 : i64, tpu.core_type = #tpu.core_type<tc>, window_params = [{transform_indices = @transform_0, window_bounds = array<i64: 1, 8, 128>}, {transform_indices = @transform_1, window_bounds = array<i64: 1, 8, 1>}, {transform_indices = @transform_2, window_bounds = array<i64: 1, 1, 3>}]} {
    %c0_i32 = arith.constant 0 : i32
    %0 = arith.cmpi eq, %arg1, %c0_i32 : i32
    %c0_i32_0 = arith.constant 0 : i32
    %1 = arith.cmpi eq, %arg2, %c0_i32_0 : i32
    %2 = arith.andi %0, %1 : i1
    %3 = arith.extui %2 : i1 to i32
    %c0_i32_1 = arith.constant 0 : i32
    %4 = arith.cmpi ne, %3, %c0_i32_1 : i32
    scf.if %4 {
      %cst_25 = arith.constant 0.000000e+00 : f32
      %57 = vector.broadcast %cst_25 : f32 to vector<1x1xf32>
      %c0_26 = arith.constant 0 : index
      %c0_27 = arith.constant 0 : index
      %58 = vector.load %arg6[%c0_26, %c0_27] : memref<1x1xf32, #tpu.memory_space<vmem>>, vector<1x1xf32>
      tpu.vector_store %arg6[%c0_26, %c0_27], %57 {strides = array<i32>} : memref<1x1xf32, #tpu.memory_space<vmem>>, vector<1x1xf32>,
      %cst_28 = arith.constant 0.000000e+00 : f32
      %59 = vector.broadcast %cst_28 : f32 to vector<1x1xf32>
      %c0_29 = arith.constant 0 : index
      %c0_30 = arith.constant 0 : index
      %60 = vector.load %arg7[%c0_29, %c0_30] : memref<1x1xf32, #tpu.memory_space<vmem>>, vector<1x1xf32>
      tpu.vector_store %arg7[%c0_29, %c0_30], %59 {strides = array<i32>} : memref<1x1xf32, #tpu.memory_space<vmem>>, vector<1x1xf32>,
      %cst_31 = arith.constant 0.000000e+00 : f32
      %61 = vector.broadcast %cst_31 : f32 to vector<1x1xf32>
      %c0_32 = arith.constant 0 : index
      %c0_33 = arith.constant 0 : index
      %62 = vector.load %arg9[%c0_32, %c0_33] : memref<1x1xf32, #tpu.memory_space<vmem>>, vector<1x1xf32>
      tpu.vector_store %arg9[%c0_32, %c0_33], %61 {strides = array<i32>} : memref<1x1xf32, #tpu.memory_space<vmem>>, vector<1x1xf32>,
      %cst_34 = arith.constant 0.000000e+00 : f32
      %63 = vector.broadcast %cst_34 : f32 to vector<1x1xf32>
      %c0_35 = arith.constant 0 : index
      %c0_36 = arith.constant 0 : index
      %64 = vector.load %arg10[%c0_35, %c0_36] : memref<1x1xf32, #tpu.memory_space<vmem>>, vector<1x1xf32>
      tpu.vector_store %arg10[%c0_35, %c0_36], %63 {strides = array<i32>} : memref<1x1xf32, #tpu.memory_space<vmem>>, vector<1x1xf32>,
      %cst_37 = arith.constant 0.000000e+00 : f32
      %65 = vector.broadcast %cst_37 : f32 to vector<1x1xf32>
      %c0_38 = arith.constant 0 : index
      %c0_39 = arith.constant 0 : index
      %66 = vector.load %arg8[%c0_38, %c0_39] : memref<1x1xf32, #tpu.memory_space<vmem>>, vector<1x1xf32>
      tpu.vector_store %arg8[%c0_38, %c0_39], %65 {strides = array<i32>} : memref<1x1xf32, #tpu.memory_space<vmem>>, vector<1x1xf32>,
    } else {
    }
    %c0 = arith.constant 0 : index
    %c0_2 = arith.constant 0 : index
    %c0_3 = arith.constant 0 : index
    %5 = vector.load %arg3[%c0, %c0_2, %c0_3] : memref<1x8x128xf32, #tpu.memory_space<vmem>>, vector<1x8x128xf32>
    %6 = vector.shape_cast %5 : vector<1x8x128xf32> to vector<8x128xf32>
    %c0_4 = arith.constant 0 : index
    %c0_5 = arith.constant 0 : index
    %c0_6 = arith.constant 0 : index
    %7 = vector.load %arg4[%c0_4, %c0_5, %c0_6] : memref<1x8x1xi32, #tpu.memory_space<vmem>>, vector<1x8x1xi32>
    %8 = vector.shape_cast %7 : vector<1x8x1xi32> to vector<8x1xi32>
    %c128_i32 = arith.constant 128 : i32
    %9 = arith.muli %arg2, %c128_i32 : i32
    %c8_i32 = arith.constant 8 : i32
    %10 = arith.muli %arg1, %c8_i32 : i32
    %11 = tpu.iota {dimensions = array<i32: 1>} : vector<8x128xi32>
    %12 = vector.broadcast %9 : i32 to vector<8x1xi32>
    %13 = arith.subi %8, %12 : vector<8x1xi32>
    %14 = vector.broadcast %13 : vector<8x1xi32> to vector<8x128xi32>
    %15 = arith.cmpi eq, %11, %14 : vector<8x128xi32>
    %cst = arith.constant 0.000000e+00 : f32
    %16 = vector.broadcast %cst : f32 to vector<8x128xf32>
    %17 = arith.select %15, %6, %16 : vector<8x128xi1>, vector<8x128xf32>
    %cst_7 = arith.constant dense<0.000000e+00> : vector<8xf32>
    %18 = vector.multi_reduction <add>, %17, %cst_7 [1] : vector<8x128xf32> to vector<8xf32>
    %19 = vector.shape_cast %18 : vector<8xf32> to vector<8x1xf32>
    %20 = tpu.iota {dimensions = array<i32: 0>} : vector<8x1xi32>
    %21 = vector.broadcast %10 : i32 to vector<8x1xi32>
    %22 = arith.addi %21, %20 : vector<8x1xi32>
    %c12_i32 = arith.constant 12 : i32
    %23 = vector.broadcast %c12_i32 : i32 to vector<8x1xi32>
    %24 = arith.cmpi slt, %22, %23 : vector<8x1xi32>
    %c-100_i32 = arith.constant -100 : i32
    %25 = vector.broadcast %c-100_i32 : i32 to vector<8x1xi32>
    %26 = arith.cmpi ne, %8, %25 : vector<8x1xi32>
    %27 = arith.andi %26, %24 : vector<8x1xi1>
    %cst_8 = arith.constant 0.000000e+00 : f32
    %28 = vector.broadcast %cst_8 : f32 to vector<8x1xf32>
    %29 = arith.subf %28, %19 : vector<8x1xf32>
    %cst_9 = arith.constant 0.000000e+00 : f32
    %30 = vector.broadcast %cst_9 : f32 to vector<8x1xf32>
    %31 = arith.select %27, %29, %30 : vector<8x1xi1>, vector<8x1xf32>
    %c1_i32 = arith.constant 1 : i32
    %32 = vector.broadcast %c1_i32 : i32 to vector<8x1xi32>
    %33 = arith.cmpi sge, %22, %32 : vector<8x1xi32>
    %c0_10 = arith.constant 0 : index
    %c0_11 = arith.constant 0 : index
    %34 = vector.load %arg6[%c0_10, %c0_11] : memref<1x1xf32, #tpu.memory_space<vmem>>, vector<1x1xf32>
    %cst_12 = arith.constant 0.000000e+00 : f32
    %35 = vector.broadcast %cst_12 : f32 to vector<8x1xf32>
    %36 = arith.select %33, %31, %35 : vector<8x1xi1>, vector<8x1xf32>
    %cst_13 = arith.constant dense<0.000000e+00> : vector<1xf32>
    %37 = vector.multi_reduction <add>, %36, %cst_13 [0] : vector<8x1xf32> to vector<1xf32>
    %38 = vector.shape_cast %37 : vector<1xf32> to vector<1x1xf32>
    %39 = arith.addf %34, %38 : vector<1x1xf32>
    %c0_14 = arith.constant 0 : index
    %c0_15 = arith.constant 0 : index
    %40 = vector.load %arg6[%c0_14, %c0_15] : memref<1x1xf32, #tpu.memory_space<vmem>>, vector<1x1xf32>
    tpu.vector_store %arg6[%c0_14, %c0_15], %39 {strides = array<i32>} : memref<1x1xf32, #tpu.memory_space<vmem>>, vector<1x1xf32>,
    %c0_i32_16 = arith.constant 0 : i32
    %41 = arith.cmpi eq, %arg2, %c0_i32_16 : i32
    %42 = arith.extui %41 : i1 to i32
    %c0_i32_17 = arith.constant 0 : i32
    %43 = arith.cmpi ne, %42, %c0_i32_17 : i32
    scf.if %43 {
      %c0_25 = arith.constant 0 : index
      %c0_26 = arith.constant 0 : index
      %57 = vector.load %arg7[%c0_25, %c0_26] : memref<1x1xf32, #tpu.memory_space<vmem>>, vector<1x1xf32>
      %58 = arith.andi %33, %27 : vector<8x1xi1>
      %cst_27 = arith.constant 1.000000e+00 : f32
      %cst_28 = arith.constant 0.000000e+00 : f32
      %59 = vector.broadcast %cst_27 : f32 to vector<8x1xf32>
      %60 = vector.broadcast %cst_28 : f32 to vector<8x1xf32>
      %61 = arith.select %58, %59, %60 : vector<8x1xi1>, vector<8x1xf32>
      %cst_29 = arith.constant dense<0.000000e+00> : vector<1xf32>
      %62 = vector.multi_reduction <add>, %61, %cst_29 [0] : vector<8x1xf32> to vector<1xf32>
      %63 = vector.shape_cast %62 : vector<1xf32> to vector<1x1xf32>
      %64 = arith.addf %57, %63 : vector<1x1xf32>
      %c0_30 = arith.constant 0 : index
      %c0_31 = arith.constant 0 : index
      %65 = vector.load %arg7[%c0_30, %c0_31] : memref<1x1xf32, #tpu.memory_space<vmem>>, vector<1x1xf32>
      tpu.vector_store %arg7[%c0_30, %c0_31], %64 {strides = array<i32>} : memref<1x1xf32, #tpu.memory_space<vmem>>, vector<1x1xf32>,
    } else {
    }
    %c0_i32_18 = arith.constant 0 : i32
    %44 = arith.cmpi eq, %arg1, %c0_i32_18 : i32
    %45 = arith.extui %44 : i1 to i32
    %c0_i32_19 = arith.constant 0 : i32
    %46 = arith.cmpi ne, %45, %c0_i32_19 : i32
    scf.if %46 {
      %c0_25 = arith.constant 0 : index
      %c0_26 = arith.constant 0 : index
      %57 = vector.load %arg8[%c0_25, %c0_26] : memref<1x1xf32, #tpu.memory_space<vmem>>, vector<1x1xf32>
      %58 = vector.extract_strided_slice %31 {offsets = [1, 0], sizes = [1, 1], strides = [1, 1]} : vector<8x1xf32> to vector<1x1xf32>
      %59 = arith.addf %57, %58 : vector<1x1xf32>
      %c0_27 = arith.constant 0 : index
      %c0_28 = arith.constant 0 : index
      %60 = vector.load %arg8[%c0_27, %c0_28] : memref<1x1xf32, #tpu.memory_space<vmem>>, vector<1x1xf32>
      tpu.vector_store %arg8[%c0_27, %c0_28], %59 {strides = array<i32>} : memref<1x1xf32, #tpu.memory_space<vmem>>, vector<1x1xf32>,
    } else {
    }
    %c0_i32_20 = arith.constant 0 : i32
    %47 = arith.cmpi eq, %arg1, %c0_i32_20 : i32
    %c2_i32 = arith.constant 2 : i32
    %48 = arith.cmpi eq, %arg2, %c2_i32 : i32
    %49 = arith.andi %47, %48 : i1
    %50 = arith.extui %49 : i1 to i32
    %c0_i32_21 = arith.constant 0 : i32
    %51 = arith.cmpi ne, %50, %c0_i32_21 : i32
    scf.if %51 {
      %c0_25 = arith.constant 0 : index
      %c0_26 = arith.constant 0 : index
      %57 = vector.load %arg8[%c0_25, %c0_26] : memref<1x1xf32, #tpu.memory_space<vmem>>, vector<1x1xf32>
      %c0_27 = arith.constant 0 : index
      %c0_28 = arith.constant 0 : index
      %58 = vector.load %arg10[%c0_27, %c0_28] : memref<1x1xf32, #tpu.memory_space<vmem>>, vector<1x1xf32>
      tpu.vector_store %arg10[%c0_27, %c0_28], %57 {strides = array<i32>} : memref<1x1xf32, #tpu.memory_space<vmem>>, vector<1x1xf32>,
    } else {
    }
    %c1_i32_22 = arith.constant 1 : i32
    %52 = arith.cmpi eq, %arg1, %c1_i32_22 : i32
    %c2_i32_23 = arith.constant 2 : i32
    %53 = arith.cmpi eq, %arg2, %c2_i32_23 : i32
    %54 = arith.andi %52, %53 : i1
    %55 = arith.extui %54 : i1 to i32
    %c0_i32_24 = arith.constant 0 : i32
    %56 = arith.cmpi ne, %55, %c0_i32_24 : i32
    scf.if %56 {
      %c0_25 = arith.constant 0 : index
      %c0_26 = arith.constant 0 : index
      %57 = vector.load %arg6[%c0_25, %c0_26] : memref<1x1xf32, #tpu.memory_space<vmem>>, vector<1x1xf32>
      %c0_27 = arith.constant 0 : index
      %c0_28 = arith.constant 0 : index
      %58 = vector.load %arg7[%c0_27, %c0_28] : memref<1x1xf32, #tpu.memory_space<vmem>>, vector<1x1xf32>
      %59 = arith.divf %57, %58 : vector<1x1xf32>
      %c0_29 = arith.constant 0 : index
      %c0_30 = arith.constant 0 : index
      %60 = vector.load %arg10[%c0_29, %c0_30] : memref<1x1xf32, #tpu.memory_space<vmem>>, vector<1x1xf32>
      %cst_31 = arith.constant 5.000000e-01 : f32
      %61 = vector.broadcast %cst_31 : f32 to vector<1x1xf32>
      %62 = arith.mulf %61, %60 : vector<1x1xf32>
      %cst_32 = arith.constant 5.000000e-01 : f32
      %63 = vector.broadcast %cst_32 : f32 to vector<1x1xf32>
      %64 = arith.mulf %63, %59 : vector<1x1xf32>
      %65 = arith.addf %62, %64 : vector<1x1xf32>
      %66 = tpu.iota {dimensions = array<i32: 1>} : vector<1x3xi32>
      %c0_i32_33 = arith.constant 0 : i32
      %67 = vector.broadcast %c0_i32_33 : i32 to vector<1x3xi32>
      %68 = arith.cmpi eq, %66, %67 : vector<1x3xi32>
      %c1_i32_34 = arith.constant 1 : i32
      %69 = vector.broadcast %c1_i32_34 : i32 to vector<1x3xi32>
      %70 = arith.cmpi eq, %66, %69 : vector<1x3xi32>
      %71 = vector.shape_cast %60 : vector<1x1xf32> to vector<1x1xf32>
      %72 = vector.broadcast %71 : vector<1x1xf32> to vector<1x3xf32>
      %73 = vector.shape_cast %59 : vector<1x1xf32> to vector<1x1xf32>
      %74 = vector.broadcast %73 : vector<1x1xf32> to vector<1x3xf32>
      %75 = arith.select %70, %72, %74 : vector<1x3xi1>, vector<1x3xf32>
      %76 = vector.shape_cast %65 : vector<1x1xf32> to vector<1x1xf32>
      %77 = vector.broadcast %76 : vector<1x1xf32> to vector<1x3xf32>
      %78 = arith.select %68, %77, %75 : vector<1x3xi1>, vector<1x3xf32>
      %c0_35 = arith.constant 0 : index
      %c0_36 = arith.constant 0 : index
      %c0_37 = arith.constant 0 : index
      %79 = vector.load %arg5[%c0_35, %c0_36, %c0_37] : memref<1x1x3xf32, #tpu.memory_space<vmem>>, vector<1x1x3xf32>
      %80 = vector.shape_cast %79 : vector<1x1x3xf32> to vector<1x3xf32>
      %81 = vector.shape_cast %78 : vector<1x3xf32> to vector<1x1x3xf32>
      tpu.vector_store %arg5[%c0_35, %c0_36, %c0_37], %81 {strides = array<i32>} : memref<1x1x3xf32, #tpu.memory_space<vmem>>, vector<1x1x3xf32>,
    } else {
    }
    return
  }
  func.func @transform_0(%arg0: i32, %arg1: i32, %arg2: i32) -> (i32, i32, i32) {
    %c0_i32 = arith.constant 0 : i32
    return %arg0, %arg1, %arg2 : i32, i32, i32
  }
  func.func @transform_1(%arg0: i32, %arg1: i32, %arg2: i32) -> (i32, i32, i32) {
    %c0_i32 = arith.constant 0 : i32
    %c0_i32_0 = arith.constant 0 : i32
    return %arg0, %arg1, %c0_i32 : i32, i32, i32
  }
  func.func @transform_2(%arg0: i32, %arg1: i32, %arg2: i32) -> (i32, i32, i32) {
    %c0_i32 = arith.constant 0 : i32
    %c0_i32_0 = arith.constant 0 : i32
    %c0_i32_1 = arith.constant 0 : i32
    return %arg0, %c0_i32, %c0_i32_0 : i32, i32, i32
  }
}

</mosaic_0001>

<bundles_post_ra>
// kernel: tpu_custom_call.1
= control target key start
LH: loop header
LB: loop body
LE: loop exit
PB: predicated region body
PF: predicated region fallthrough
CT: control target
= control target key end

     0   :  { %7 = vsyncpa [#allocation8], 0  ;;  %s918_s0 = inlined_call_operand.vmem [shape: f32[2,12,320], index: 0, kind: input, shape index: {}]   ;;  %s919_s1 = inlined_call_operand.vmem [shape: s32[2,12,1], index: 1, kind: input, shape index: {}]   ;;  %s920_s2 = inlined_call_operand.hbm [shape: f32[2,1,3], index: 2, kind: output, shape index: {}]  }
   0x1   :  { %9 = vsyncpa [#allocation8 + $0x1], 0  ;;  %s719_s9 = smov 0   ;;  %s721_s10 = smov 0  }
   0x2   :  { %s723_s11 = smov 0   ;;  %s725_s12 = smov 0  }
   0x3   :  { %s727_s13 = smov 0   ;;  %s729_s14 = smov 0  }
   0x4   :  { %s731_s15 = smov 0   ;;  %s733_s16 = smov 0  }
   0x5   :  { %s735_s17 = smov 0   ;;  %s737_s18 = smov 0  }
   0x6 LB: > { %925 = sst [smem:[#allocation10_spill]] %s684_s15  ;;  %s472_s19 = sadd.s32 4294967295, %s696_s18   ;;  %s696_s18 = sphi %s737_s18, %s15_s18   ;;  %s692_s17 = sphi %s735_s17, %s942_s17   ;;  %s688_s16 = sphi %s733_s16, %s941_s16   ;;  %s684_s15 = sphi %s731_s15, %s940_s15   ;;  %s680_s14 = sphi %s729_s14, %s939_s14   ;;  %s676_s13 = sphi %s727_s13, %s938_s13   ;;  %s672_s12 = sphi %s725_s12, %s937_s12   ;;  %s668_s11 = sphi %s723_s11, %s945_s11   ;;  %s664_s10 = sphi %s721_s10, %s944_s10   ;;  %s660_s9 = sphi %s719_s9, %s943_s9  }
   0x7   : > { %926 = sst [smem:[#allocation11_spill]] %s688_s16  ;;  %s473_s20 = sadd.s32 4294967294, %s696_s18  }
   0x8   : > { %927 = sst [smem:[#allocation12_spill]] %s692_s17  ;;  %s27_s21 = sadd.s32 1, %s684_s15 }
   0x9   : > { %p28_p0 = scmp.ge.s32.totalorder %s27_s21, 3  ;;  %s30_s22 = sadd.s32 1, %s688_s16 }
   0xa   : > { %s34_s23 = sadd.s32 1, %s692_s17  ;;  %p109_p1 = scmp.ne.s32.totalorder %s668_s11, %s664_s10 }
   0xb   : > { %s947_s21 = smov (%p28_p0, %s27_s21), 0  ;;  %s949_s22 = smov (!%p28_p0, %s30_s22), %s688_s16 }
   0xc   : > { %928 = sst [smem:[#allocation13_spill]] %s947_s21  ;;  %p110_p2 = scmp.eq.s32.totalorder %s472_s19, 11 }
   0xd   : > { %p115_p3 = scmp.ne.s32.totalorder %s664_s10, %s660_s9  ;;  %p32_p4 = scmp.ge.s32.totalorder %s949_s22, 2 }
   0xe   : > { %p116_p5 = scmp.eq.s32.totalorder %s473_s20, 11  ;;  %p781_p6 = por %p110_p2, %p109_p1 }
   0xf   : > { %p476_p7 = scmp.ge.s32.totalorder %s696_s18, 1  ;;  %s951_s22 = smov (%p32_p4, %s949_s22), 0 }
  0x10   : > { %930 = sst [smem:[#allocation14_spill]] %s951_s22  ;;  %s953_s23 = smov (!%p32_p4, %s34_s23), %s692_s17 }
  0x11   : > { %p789_p8 = por %p116_p5, %p115_p3  ;;  %p160_p9 = scmp.lt.s32.totalorder %s696_s18, 13 }
  0x12   : > { %p36_p10 = scmp.ge.s32.totalorder %s953_s23, 2  ;;  %s99_s27 = sadd.s32 1, %s668_s11 }
  0x13   : > { %p161_p11 = pnand %p476_p7, %p160_p9 }
  0x14   : > { %s955_s23 = smov (%p36_p10, %s953_s23), 0  ;;  %p196_p13 = scmp.lt.s32.totalorder (!%p161_p11), %s680_s14, 1 }
  0x15   : > { %932 = sst [smem:[#allocation15_spill]] %s955_s23  ;;  %s96_s26 = ssub.s32 %s692_s17, %s955_s23 }
  0x16   : > { %p97_p12 = scmp.eq.s32.totalorder %s96_s26, 0  ;;  %164 = sbr.rel (%p161_p11) target bundleno = 545 (0x221), region = 28 }
  0x17   : > { %p198_p0 = scmp.lt.s32.totalorder (!%p161_p11), %s676_s13, 1  ;;  %p200_p1 = scmp.lt.s32.totalorder (!%p161_p11), %s672_s12, 2 }
  0x18   : > { %s800_s28 = scalar_select %p97_p12, %s668_s11, %s99_s27  }
  0x19   : > { %p216_p2 = scmp.eq.s32.totalorder (!%p161_p11), %s676_s13, 0  ;;  %p217_p3 = scmp.eq.s32.totalorder (!%p161_p11), %s672_s12, 0 }
  0x1a   : > { %s933_s15 = sand.u32 (!%p161_p11), 1, %s664_s10  }
  0x1b   : > { %p218_p4 = pnand (!%p161_p11), %p217_p3, %p216_p2 }
  0x1d   : > { %s197_s30 = scalar_select %p196_p13, %s680_s14, 1 }
  0x1e   : > { %s199_s3 = scalar_select %p198_p0, %s676_s13, 1 }
  0x1f   : > { %s488_s4 = smul.u32 6, %s197_s30  ;;  %s478_s6 = sshll.u32 %s197_s30, 1  ;;  %vm222_vm0 = vcmask (!%p218_p4), 0   ;;  %v698_v0 = vmov (!%p218_p4), 0.0  }
  0x20   : > { %s487_s5 = smul.u32 3, %s199_s3  ;;  %s213_s8 = sadd.s32 %s478_s6, %s199_s3  ;;  %223 = vst.msk [vmem:[#allocation2] sm:$0x1] (!%p218_p4), %vm222_vm0, %v698_v0  ;;  %224 = vst.msk [vmem:[#allocation3] sm:$0x1] (!%p218_p4), %vm222_vm0, %v698_v0 }
  0x21   : > { %s201_s7 = scalar_select %p200_p1, %s672_s12, 2 }
  0x22   : > { %s479_s20 = sshll.u32 %s213_s8, 3  ;;  %s821_s30 = scalar_lea.vmem [#allocation7], %s933_s15  ;;  %226 = vst.msk [vmem:[#allocation6] sm:$0x1] (!%p218_p4), %vm222_vm0, %v698_v0  ;;  %227 = vst.msk [vmem:[#allocation4] sm:$0x1] (!%p218_p4), %vm222_vm0, %v698_v0 }
  0x23   : > { %s203_s19 = sadd.s32 %s487_s5, %s201_s7  ;;  %s215_s29 = scalar_lea.vmem %s919_s1, %s479_s20 }
  0x24   : > { %s205_s26 = sadd.s32 %s488_s4, %s203_s19  ;;  %221 = sbr.rel (%p218_p4) target bundleno = 43 (0x2b), region = 32 }
  0x25   : > { %s477_s22 = sshll.u32 %s205_s26, 3 }
  0x26   : > { %s207_s16 = scalar_lea.vmem %s918_s0, %s477_s22 }
  0x2b PF: > { %v229_v1 = vld [vmem:[%s215_s29] sm:$0xff]  ;;  %s480_s23 = sshll.u32 %s672_s12, 7  ;;  %v699_v2 = vmov 0   ;;  %v232_v5 = vlaneseq  ;;  %s481_s15 = sshll.u32 %s676_s13, 3  ;;  %vm255_vm6 = vcmask 7168   ;;  %vm264_vm7 = vcmask 0  }
  0x2c   : > { %581 = vset.pattern.permute.xlu0 %v699_v2  ;;  %v234_v3 = vstv %s480_s23  ;;  %v245_v7 = vstv %s481_s15  ;;  %vm248_vm1 = vcmp.ne.s32.totalorder %v229_v1, 4294967196  ;;  %v228_v11 = vld [vmem:[%s207_s16] sm:$0xff]  ;;  %p482_p5 = scmp.ne.s32.totalorder %s672_s12, 0 }
  0x2d   : > { %v235_v4 = vsub.s32 %v229_v1, %v234_v3  ;;  %v824_v6 = vshrl.u32 %v232_v5, 7  ;;  %v832_v10 = vand.u32 127, %v232_v5  ;;  %v253_v24 = vld [vmem:[#allocation2] sm:$0x1]  ;;  %v700_v27 = vmov (!%p482_p5), 0.0  }
  0x2e   : > { %v269_v35 = vld [vmem:[#allocation3] sm:$0x1] (!%p482_p5) }
  0x2f   : > { %237 = vperm.xlu0 %581, %v235_v4   ;;  %v246_v8 = vadd.s32 %v245_v7, %v824_v6 }
  0x31   : > { %vm247_vm2 = vcmp.lt.s32.totalorder %v246_v8, 12  ;;  %vm252_vm5 = vcmp.ge.s32.totalorder %v246_v8, 1 }
  0x32   : > { %vm828_vm3 = vmand %vm248_vm1, %vm247_vm2 }
  0x33   : > { %vm270_vm8 = vmand (!%p482_p5), %vm252_vm5, %vm828_vm3 }
  0x34   : > { %v271_v28 = vsel (!%p482_p5), %vm270_vm8, 1.0, %v700_v27 }
  0x35   : > { %v272_v29 = vsel (!%p482_p5), %vm255_vm6, %v271_v28, 0.0 }
  0x36   : > { %v273_v30 = vrot.slane (!%p482_p5), %v272_v29, 4 }
  0x38   : > { %v274_v31 = vadd.f32 (!%p482_p5), %v273_v30, %v272_v29 }
  0x3a   : > { %v275_v32 = vrot.slane (!%p482_p5), %v274_v31, 2 }
  0x3c   : > { %v276_v33 = vadd.f32 (!%p482_p5), %v275_v32, %v274_v31 }
  0x3e   : > { %v277_v34 = vrot.slane (!%p482_p5), %v276_v33, 1 }
  0x40   : > { %v278_v36 = vadd.f32 (!%p482_p5), %v277_v34, %v276_v33 }
  0x42   : > { %v279_v37 = vadd.f32 (!%p482_p5), %v278_v36, %v269_v35 }
  0x44   : > { %280 = vst.msk [vmem:[#allocation3] sm:$0x1] (!%p482_p5), %vm264_vm7, %v279_v37 }
  0xae   : > { %v238_v12 = vpop.permute.xlu0 %237 }
  0xaf   : > { %vm239_vm4 = vcmp.eq.s32.totalorder %v832_v10, %v238_v12 }
  0xb0   : > { %v240_v13 = vsel %vm239_vm4, %v228_v11, 0.0 }
  0xb1   : > { %241 = vadd.xlane.f32.xlu0 %v240_v13 }
 0x13e   : > { %v242_v14 = vpop.xlane.xlu0 %241 }
 0x13f   : > { %v250_v15 = vsub.f32 0.0, %v242_v14 }
 0x141   : > { %v251_v16 = vsel %vm828_vm3, %v250_v15, 0.0 }
 0x142   : > { %v254_v17 = vsel %vm252_vm5, %v251_v16, 0.0 }
 0x143   : > { %v256_v18 = vsel %vm255_vm6, %v254_v17, 0.0 }
 0x144   : > { %v257_v19 = vrot.slane %v256_v18, 4 }
 0x146   : > { %v258_v20 = vadd.f32 %v257_v19, %v256_v18 }
 0x148   : > { %v259_v21 = vrot.slane %v258_v20, 2 }
 0x14a   : > { %v260_v22 = vadd.f32 %v259_v21, %v258_v20 }
 0x14c   : > { %v261_v23 = vrot.slane %v260_v22, 1  ;;  %268 = sbr.rel (%p482_p5) target bundleno = 339 (0x153), region = 36 }
 0x14e   : > { %v262_v25 = vadd.f32 %v261_v23, %v260_v22 }
 0x150   : > { %v263_v26 = vadd.f32 %v262_v25, %v253_v24 }
 0x152   : > { %265 = vst.msk [vmem:[#allocation2] sm:$0x1] %vm264_vm7, %v263_v26 }
 0x153 PF: > { %p483_p7 = scmp.ne.s32.totalorder %s676_s13, 0 }
 0x154   : > { %v701_v38 = vmov (!%p483_p7), 1966171168   ;;  %v284_v44 = vld [vmem:[#allocation4] sm:$0x1] (!%p483_p7) }
 0x155   : > { %283 = sbr.rel (%p483_p7) target bundleno = 356 (0x164), region = 40  ;;  %v287_v39 = vunpack.c.l.s4 (!%p483_p7), %v701_v38 }
 0x157   : > { %v288_v40 = vunpack.c.0.s8 (!%p483_p7), %v287_v39 }
 0x159   : > { %v291_v41 = vsub.s32 (!%p483_p7), %v288_v40, %v824_v6 }
 0x15b   : > { %v292_v42 = vrot.slane (!%p483_p7), %v251_v16, %v291_v41 }
 0x15d   : > { %v293_v43 = vcombine.high %v292_v42, %v292_v42 }
 0x15f   : > { %v300_v45 = vrot.slane %v293_v43, %v291_v41 }
 0x161   : > { %v302_v46 = vadd.f32 %v300_v45, %v284_v44 }
 0x163   : > { %303 = vst.msk [vmem:[#allocation4] sm:$0x1] %vm264_vm7, %v302_v46 }
 0x164 PF: > { %p304_p9 = scmp.eq.s32.totalorder %s672_s12, 2 }
 0x166   : > { %p305_p10 = pnand %p304_p9, %p216_p2 }
 0x168   : > { %308 = sbr.rel (%p305_p10) target bundleno = 367 (0x16f), region = 44 }
 0x16a   : > { %v309_v47 = vld [vmem:[#allocation4] sm:$0x1] (!%p305_p10) }
 0x16b   : > { %310 = vst.msk [vmem:[#allocation6] sm:$0x1] (!%p305_p10), %vm264_vm7, %v309_v47 }
 0x16f PF: > { %p311_p11 = scmp.eq.s32.totalorder %s676_s13, 1 }
 0x171   : > { %p312_p12 = pnand %p311_p11, %p304_p9 }
 0x172   : > { %v320_v48 = vld [vmem:[#allocation6] sm:$0x1] (!%p312_p12)  ;;  %v702_v49 = vmov (!%p312_p12), 0   ;;  %v317_v50 = vld [vmem:[#allocation3] sm:$0x1] (!%p312_p12)  ;;  %v333_v58 = vsub.s32 (!%p312_p12), 0, %v824_v6 }
 0x173   : > { %315 = sbr.rel (%p312_p12) target bundleno = 520 (0x208), region = 48  ;;  %582 = vset.pattern.permute.xlu0 (!%p312_p12), %v702_v49  ;;  %583 = vset.pattern.permute.xlu1 (!%p312_p12), %v702_v49  ;;  %584 = vrcp.f32 (!%p312_p12), %v317_v50  ;;  %v316_v51 = vld [vmem:[#allocation2] sm:$0x1] (!%p312_p12)  ;;  %v321_v53 = vmul.f32 (!%p312_p12), 0.5, %v320_v48  ;;  %vm325_vm9 = vcmp.eq.s32.totalorder (!%p312_p12), %v832_v10, 1  ;;  %vm324_vm10 = vcmp.eq.s32.totalorder (!%p312_p12), %v832_v10, 0 }
 0x174   : > { %328 = vperm.xlu0 (!%p312_p12), %582, %v320_v48   ;;  %vm355_vm11 = vcmask (!%p312_p12), 16384  }
 0x17d   : > { %v585_v52 = vpop.eup %584 }
 0x17e   : > { %v319_v54 = vmul.f32 %v585_v52, %v316_v51 }
 0x180   : > { %337 = vperm.xlu0 %582, %v319_v54   ;;  %v322_v55 = vmul.f32 0.5, %v319_v54 }
 0x182   : > { %v323_v56 = vadd.f32 %v322_v55, %v321_v53 }
 0x184   : > { %347 = vperm.xlu1 %583, %v323_v56  }
 0x1f3   : > { %v329_v57 = vpop.permute.xlu0 %328 }
 0x1f4   : > { %v334_v60 = vrot.slane %v329_v57, %v333_v58 }
 0x1ff   : > { %v338_v59 = vpop.permute.xlu0 %337 }
 0x200   : > { %v343_v61 = vrot.slane %v338_v59, %v333_v58 }
 0x202   : > { %v344_v0 = vsel %vm325_vm9, %v334_v60, %v343_v61 }
 0x203   : > { %v348_v62 = vpop.permute.xlu1 %347 }
 0x204   : > { %v353_v63 = vrot.slane %v348_v62, %v333_v58 }
 0x206   : > { %v354_v1 = vsel %vm324_vm10, %v353_v63, %v344_v0 }
 0x207   : > { %356 = vst.msk [vmem:[%s821_s30] sm:$0x1] %vm355_vm11, %v354_v1 }
 0x208 PF: > { %s484_s12 = sshll.u32 %s680_s14, 4  ;;  %s370_s21 = sshll.u32 %s821_s30, 4  ;;  %s371_s21 = int_to_ptr.vmem [resolvable:$true] %s370_s21 }
 0x209   : > { %s862_s17 = scalar_lea.hbm %s920_s2, %s484_s12  ;;  %s936_s22 = sand.u32 1, %s664_s10  }
 0x20a   : > { %s358_s29 = scalar_lea.sflag [#allocation8], %s936_s22  ;;  %s586_s3 = scalar_lea.vmem %s371_s21, 16 }
 0x20b   : > { %p587_p13 = scmp.ne.s32.totalorder %s371_s21, %s586_s3  ;;  %s703_s4 = smov [#allocation7]  }
 0x20c   : > { %s590_s5 = sshll.u32 %s703_s4, 4  ;;  %s591_s5 = int_to_ptr.vmem [resolvable:$false] %s590_s5 }
 0x20d   : > { %p588_p0 = pnand %p587_p13, %p781_p6  ;;  %s592_s6 = scalar_lea.vmem %s591_s5, 32 }
 0x20e   : > { %p593_p2 = scmp.lt.s32.totalorder %s371_s21, %s591_s5  ;;  %p594_p3 = scmp.lt.s32.totalorder %s592_s6, %s586_s3 }
 0x20f   : > { %p589_p1 = pneg %p588_p0 }
 0x210   : > { %p595_p4 = por %p594_p3, %p593_p2 }
 0x212   : > { %p596_p5 = pnand %p595_p4, %p589_p1 }
 0x214   : > { %599 = shalt.err (!%p596_p5)
}
 0x215   : > { %s600_s14 = scalar_lea.hbm %s862_s17, 16  ;;  %s604_s19 = scalar_lea.hbm %s920_s2, 32 }
 0x216   : > { %p601_p7 = scmp.ne.s32.totalorder %s862_s17, %s600_s14  ;;  %p605_p11 = scmp.lt.u32.totalorder %s862_s17, %s920_s2 }
 0x217   : > { %p606_p12 = scmp.lt.u32.totalorder %s604_s19, %s600_s14  ;;  %p608_p0 = scmp.lt.u32.totalorder %s600_s14, %s862_s17 }
 0x218   : > { %p602_p9 = pnand %p601_p7, %p781_p6 }
 0x219   : > { %p607_p13 = por %p606_p12, %p605_p11 }
 0x21a   : > { %p603_p10 = pneg %p602_p9 }
 0x21b   : > { %p609_p1 = por %p608_p0, %p607_p13 }
 0x21d   : > { %p610_p2 = pnand %p609_p1, %p603_p10 }
 0x21f   : > { %613 = shalt.err (!%p610_p2)
}
 0x220   : > { %489 = dma.vmem_to_hbm [thread:$0]  (%p781_p6), %s371_s21, 16, %s862_s17, %s358_s29  }
 0x221 PF: > { %p495_p3 = scmp.ge.s32.totalorder %s696_s18, 2  ;;  %s382_s27 = sand.u32 1, %s660_s9  }
 0x222   : > { %s383_s30 = scalar_lea.sflag [#allocation8], %s382_s27 }
 0x223   : > { %p492_p4 = pnand %p495_p3, %p789_p8 }
 0x225   : > { %655 = dma.done.wait (!%p492_p4), %s383_s30, 16  }
 0x226   : > { %657 = vsyncadd (!%p492_p4), %s383_s30, 4294967280  ;;  %s15_s18 = sadd.s32 1, %s696_s18   ;;  %s937_s12 = sld [smem:[#allocation10_spill]] }
 0x227   : > { %p12_p5 = scmp.ge.s32.totalorder %s15_s18, 14   ;;  %s938_s13 = sld [smem:[#allocation11_spill]] }
 0x228   : > { %s939_s14 = sld [smem:[#allocation12_spill]]  ;;  %s940_s15 = sld [smem:[#allocation13_spill]] }
 0x229   : > { %s941_s16 = sld [smem:[#allocation14_spill]]  ;;  %s942_s17 = sld [smem:[#allocation15_spill]] }
 0x22a   : > { %s943_s9 = smov %s664_s10  ;;  %s944_s10 = smov %s668_s11 }
 0x22b   : > { %s945_s11 = smov %s800_s28  ;;  %14 = sbr.rel (!%p12_p5) target bundleno = 6 (0x6), region = 86 }
 0x232   :  { %387 = vsyncpa [#allocation8], 1 }
 0x233   :  { %389 = vsyncpa [#allocation8 + $0x1], 1 }

</bundles_post_ra>
